<compile_context>
chip_gen: v7x
topology: tpu7x:2x2x1
jax: 0.10.0
libtpu: 0.0.40
codegen_flags: <defaults>
</compile_context>

<pallas_src>
import functools

import jax
import jax.numpy as jnp
from jax.experimental import pallas as pl
from jax.experimental.pallas import tpu as pltpu

LIFT_D = 19
IN_DIM = 4 + LIFT_D  # 23
OUT_DIM = 4


def _decoder_kernel(y_ref, w1_ref, b1_ref, w2_ref, b2_ref, w3_ref, b3_ref,
                    o_ref, *, sub_b):
    # y_ref: (block_b, IN_DIM) batch-major, o_ref: (block_b, OUT_DIM).
    # Weights are (out, in) -- same as nn.Linear.weight.
    # b1/b2 are (H, 1) column vectors (feature-major adds), b3 is (1, OUT_DIM).
    w1 = w1_ref[...]
    b1 = b1_ref[...]
    w2 = w2_ref[...]
    b2 = b2_ref[...]
    w3 = w3_ref[...]
    b3 = b3_ref[...]

    block_b = y_ref.shape[0]
    n_sub = block_b // sub_b

    def body(j, carry):
        start = pl.multiple_of(j * sub_b, sub_b)
        y_tile = y_ref[pl.ds(start, sub_b), :]            # (sub_b, IN_DIM)

        # Feature-major hidden activations: (H, sub_b), lane axis = batch.
        # Contract the feature axes directly (w1 @ y_tile^T on the MXU).
        h1 = jnp.tanh(
            jax.lax.dot_general(w1, y_tile, (((1,), (1,)), ((), ())),
                                preferred_element_type=jnp.float32) + b1)
        h2 = jnp.tanh(
            jnp.dot(w2, h1, preferred_element_type=jnp.float32) + b2)

        # Contract the hidden axis so the result comes out batch-major
        # (sub_b, OUT_DIM); no explicit output transpose is ever materialized.
        out = jax.lax.dot_general(h2, w3, (((0,), (1,)), ((), ())),
                                  preferred_element_type=jnp.float32) + b3
        o_ref[pl.ds(start, sub_b), :] = out.astype(o_ref.dtype)
        return carry

    jax.lax.fori_loop(0, n_sub, body, 0, unroll=True)


@functools.partial(jax.jit, static_argnames=("block_b", "sub_b",
                                              "core_parallel"))
def decoder_forward(y, w1, b1, w2, b2, w3, b3, *,
                    block_b=8192, sub_b=512, core_parallel=False):
    """y: (B, 23) float32 -> (B, 4) float32.

    Weights are (out_features, in_features) (PyTorch layout); b1/b2 are
    (H, 1) and b3 is (1, 4).  block_b should be a multiple of 128; for small
    batches we fall back to a single full-batch tile.  sub_b bounds the live
    (H, sub_b) intermediates inside the kernel.
    """
    B, d_in = y.shape
    assert d_in == IN_DIM
    H = w1.shape[0]

    block_b = min(block_b, B)          # single tile if the batch is tiny
    sub_b = min(sub_b, block_b)
    if block_b % sub_b != 0:
        sub_b = block_b
    grid = (pl.cdiv(B, block_b),)

    # Grid-invariant weight/bias blocks: same (0, 0) block every step.
    const = lambda shape: pl.BlockSpec(shape, lambda i: (0, 0))

    cost = pl.CostEstimate(
        flops=2 * B * (IN_DIM * H + H * H + H * OUT_DIM),
        transcendentals=2 * B * H,
        bytes_accessed=4 * (B * (IN_DIM + OUT_DIM)
                            + IN_DIM * H + H
                            + H * H + H
                            + H * OUT_DIM + OUT_DIM),
    )

    # v7x: pass core_parallel=True to shard batch tiles across both
    # TensorCores explicitly; "parallel" is the portable default elsewhere.
    dim_sem = (pltpu.CORE_PARALLEL,) if core_parallel else ("parallel",)

    return pl.pallas_call(
        functools.partial(_decoder_kernel, sub_b=sub_b),
        out_shape=jax.ShapeDtypeStruct((B, OUT_DIM), y.dtype),
        grid_spec=pltpu.PrefetchScalarGridSpec(
            num_scalar_prefetch=0,
            grid=grid,
            in_specs=[
                pl.BlockSpec((block_b, IN_DIM), lambda i: (i, 0)),   # y tile
                const((H, IN_DIM)),                                  # w1
                const((H, 1)),                                       # b1
                const((H, H)),                                       # w2
                const((H, 1)),                                       # b2
                const((OUT_DIM, H)),                                 # w3
                const((1, OUT_DIM)),                                 # b3
            ],
            out_specs=pl.BlockSpec((block_b, OUT_DIM), lambda i: (i, 0)),
        ),
        compiler_params=pltpu.CompilerParams(dimension_semantics=dim_sem),
        cost_estimate=cost,
    )(y, w1, b1, w2, b2, w3, b3)


def init_decoder_params(key, n_hidden):
    """Mimic the module's __init__: weight ~ N(0, 0.1), bias = 0.

    Weights are (out_features, in_features) -- same as nn.Linear.weight.
    b1/b2 are (out, 1) columns; b3 is (1, out) to match the batch-major
    final layer."""
    k1, k2, k3 = jax.random.split(key, 3)
    w1 = 0.1 * jax.random.normal(k1, (n_hidden, IN_DIM), jnp.float32)
    b1 = jnp.zeros((n_hidden, 1), jnp.float32)
    w2 = 0.1 * jax.random.normal(k2, (n_hidden, n_hidden), jnp.float32)
    b2 = jnp.zeros((n_hidden, 1), jnp.float32)
    w3 = 0.1 * jax.random.normal(k3, (OUT_DIM, n_hidden), jnp.float32)
    b3 = jnp.zeros((1, OUT_DIM), jnp.float32)
    return w1, b1, w2, b2, w3, b3


def decoder_reference(y, w1, b1, w2, b2, w3, b3):
    """Pure-JAX reference, batch-major like the PyTorch module."""
    h1 = jnp.tanh(y @ w1.T + b1[:, 0])
    h2 = jnp.tanh(h1 @ w2.T + b2[:, 0])
    return h2 @ w3.T + b3[0, :]


if __name__ == "__main__":
    key = jax.random.PRNGKey(0)
    k_params, k_in = jax.random.split(key)

    n_hidden = 32
    batch = 256          # with block_b=128 -> grid=(2,): exercises >1 tile

    params = init_decoder_params(k_params, n_hidden)
    y = jax.random.normal(k_in, (batch, IN_DIM), jnp.float32)

    out = decoder_forward(y, *params, block_b=128)
    out = jax.block_until_ready(out)

    ref = decoder_reference(y, *params)
    assert out.shape == (batch, OUT_DIM)
    assert jnp.allclose(out, ref, atol=1e-5, rtol=1e-5), "mismatch vs reference"

    print("KERNEL_OK")
</pallas_src>

<mosaic_0001>
module attributes {stable_mosaic.version = 11 : i64} {
  func.func @_decoder_kernel(%arg0: i32, %arg1: memref<128x23xf32, #tpu.memory_space<vmem>>, %arg2: memref<32x23xf32, #tpu.memory_space<vmem>>, %arg3: memref<32x1xf32, #tpu.memory_space<vmem>>, %arg4: memref<32x32xf32, #tpu.memory_space<vmem>>, %arg5: memref<32x1xf32, #tpu.memory_space<vmem>>, %arg6: memref<4x32xf32, #tpu.memory_space<vmem>>, %arg7: memref<1x4xf32, #tpu.memory_space<vmem>>, %arg8: memref<128x4xf32, #tpu.memory_space<vmem>>) attributes {dimension_semantics = [#tpu.dimension_semantics<parallel>], iteration_bounds = array<i64: 2>, scalar_prefetch = 0 : i64, scratch_operands = 0 : i64, tpu.core_type = #tpu.core_type<tc>, window_params = [{transform_indices = @transform_0, window_bounds = array<i64: 128, 23>}, {pipeline_mode = #tpu.pipeline_mode<synchronous>, transform_indices = @transform_1, window_bounds = array<i64: 32, 23>}, {pipeline_mode = #tpu.pipeline_mode<synchronous>, transform_indices = @transform_2, window_bounds = array<i64: 32, 1>}, {pipeline_mode = #tpu.pipeline_mode<synchronous>, transform_indices = @transform_3, window_bounds = array<i64: 32, 32>}, {pipeline_mode = #tpu.pipeline_mode<synchronous>, transform_indices = @transform_4, window_bounds = array<i64: 32, 1>}, {pipeline_mode = #tpu.pipeline_mode<synchronous>, transform_indices = @transform_5, window_bounds = array<i64: 4, 32>}, {pipeline_mode = #tpu.pipeline_mode<synchronous>, transform_indices = @transform_6, window_bounds = array<i64: 1, 4>}, {transform_indices = @transform_7, window_bounds = array<i64: 128, 4>}]} {
    %c0 = arith.constant 0 : index
    %c0_0 = arith.constant 0 : index
    %0 = vector.load %arg2[%c0, %c0_0] : memref<32x23xf32, #tpu.memory_space<vmem>>, vector<32x23xf32>
    %c0_1 = arith.constant 0 : index
    %c0_2 = arith.constant 0 : index
    %1 = vector.load %arg3[%c0_1, %c0_2] : memref<32x1xf32, #tpu.memory_space<vmem>>, vector<32x1xf32>
    %c0_3 = arith.constant 0 : index
    %c0_4 = arith.constant 0 : index
    %2 = vector.load %arg4[%c0_3, %c0_4] : memref<32x32xf32, #tpu.memory_space<vmem>>, vector<32x32xf32>
    %c0_5 = arith.constant 0 : index
    %c0_6 = arith.constant 0 : index
    %3 = vector.load %arg5[%c0_5, %c0_6] : memref<32x1xf32, #tpu.memory_space<vmem>>, vector<32x1xf32>
    %c0_7 = arith.constant 0 : index
    %c0_8 = arith.constant 0 : index
    %4 = vector.load %arg6[%c0_7, %c0_8] : memref<4x32xf32, #tpu.memory_space<vmem>>, vector<4x32xf32>
    %c0_9 = arith.constant 0 : index
    %c0_10 = arith.constant 0 : index
    %5 = vector.load %arg7[%c0_9, %c0_10] : memref<1x4xf32, #tpu.memory_space<vmem>>, vector<1x4xf32>
    %c0_i32 = arith.constant 0 : i32
    %c128_i32 = arith.constant 128 : i32
    %6 = arith.muli %c0_i32, %c128_i32 : i32
    %7 = tpu.assume_multiple %6, 128 : i32
    %8 = arith.index_cast %7 : i32 to index
    %c0_11 = arith.constant 0 : index
    %9 = vector.load %arg1[%8, %c0_11] : memref<128x23xf32, #tpu.memory_space<vmem>>, vector<128x23xf32>
    %cst = arith.constant dense<0.000000e+00> : vector<32x128xf32>
    %10 = tpu.matmul %0, %9, %cst {dimension_numbers = #tpu.dot_dimension_numbers<[1], [1], [0], [0], [0, 0, 1, 0], [], []>} : vector<32x23xf32>, vector<128x23xf32>, vector<32x128xf32> -> vector<32x128xf32>
    %11 = vector.broadcast %1 : vector<32x1xf32> to vector<32x128xf32>
    %12 = arith.addf %10, %11 : vector<32x128xf32>
    %13 = math.tanh %12 : vector<32x128xf32>
    %cst_12 = arith.constant dense<0.000000e+00> : vector<32x128xf32>
    %14 = tpu.matmul %2, %13, %cst_12 {dimension_numbers = #tpu.dot_dimension_numbers<[1], [0], [0], [1], [0, 0, 1, 1], [], []>} : vector<32x32xf32>, vector<32x128xf32>, vector<32x128xf32> -> vector<32x128xf32>
    %15 = vector.broadcast %3 : vector<32x1xf32> to vector<32x128xf32>
    %16 = arith.addf %14, %15 : vector<32x128xf32>
    %17 = math.tanh %16 : vector<32x128xf32>
    %cst_13 = arith.constant dense<0.000000e+00> : vector<128x4xf32>
    %18 = tpu.matmul %17, %4, %cst_13 {dimension_numbers = #tpu.dot_dimension_numbers<[0], [1], [1], [0], [0, 1, 1, 0], [], []>} : vector<32x128xf32>, vector<4x32xf32>, vector<128x4xf32> -> vector<128x4xf32>
    %19 = vector.broadcast %5 : vector<1x4xf32> to vector<128x4xf32>
    %20 = arith.addf %18, %19 : vector<128x4xf32>
    %21 = arith.index_cast %7 : i32 to index
    %c0_14 = arith.constant 0 : index
    %22 = vector.load %arg8[%21, %c0_14] : memref<128x4xf32, #tpu.memory_space<vmem>>, vector<128x4xf32>
    tpu.vector_store %arg8[%21, %c0_14], %20 {strides = array<i32>} : memref<128x4xf32, #tpu.memory_space<vmem>>, vector<128x4xf32>,
    %c1_i32 = arith.constant 1 : i32
    return
  }
  func.func @transform_0(%arg0: i32) -> (i32, i32) {
    %c0_i32 = arith.constant 0 : i32
    %c0_i32_0 = arith.constant 0 : i32
    return %arg0, %c0_i32 : i32, i32
  }
  func.func @transform_1(%arg0: i32) -> (i32, i32) {
    %c0_i32 = arith.constant 0 : i32
    %c0_i32_0 = arith.constant 0 : i32
    %c0_i32_1 = arith.constant 0 : i32
    return %c0_i32, %c0_i32_0 : i32, i32
  }
  func.func @transform_2(%arg0: i32) -> (i32, i32) {
    %c0_i32 = arith.constant 0 : i32
    %c0_i32_0 = arith.constant 0 : i32
    %c0_i32_1 = arith.constant 0 : i32
    return %c0_i32, %c0_i32_0 : i32, i32
  }
  func.func @transform_3(%arg0: i32) -> (i32, i32) {
    %c0_i32 = arith.constant 0 : i32
    %c0_i32_0 = arith.constant 0 : i32
    %c0_i32_1 = arith.constant 0 : i32
    return %c0_i32, %c0_i32_0 : i32, i32
  }
  func.func @transform_4(%arg0: i32) -> (i32, i32) {
    %c0_i32 = arith.constant 0 : i32
    %c0_i32_0 = arith.constant 0 : i32
    %c0_i32_1 = arith.constant 0 : i32
    return %c0_i32, %c0_i32_0 : i32, i32
  }
  func.func @transform_5(%arg0: i32) -> (i32, i32) {
    %c0_i32 = arith.constant 0 : i32
    %c0_i32_0 = arith.constant 0 : i32
    %c0_i32_1 = arith.constant 0 : i32
    return %c0_i32, %c0_i32_0 : i32, i32
  }
  func.func @transform_6(%arg0: i32) -> (i32, i32) {
    %c0_i32 = arith.constant 0 : i32
    %c0_i32_0 = arith.constant 0 : i32
    %c0_i32_1 = arith.constant 0 : i32
    return %c0_i32, %c0_i32_0 : i32, i32
  }
  func.func @transform_7(%arg0: i32) -> (i32, i32) {
    %c0_i32 = arith.constant 0 : i32
    %c0_i32_0 = arith.constant 0 : i32
    return %arg0, %c0_i32 : i32, i32
  }
}

</mosaic_0001>

<bundles_post_ra>
// kernel: decoder_forward.1
= control target key start
LH: loop header
LB: loop body
LE: loop exit
PB: predicated region body
PF: predicated region fallthrough
CT: control target
= control target key end

     0   :  { %s1224_s24 = smov 0   ;;  %s1418_s0 = inlined_call_operand.vmem [shape: f32[256,23], index: 0, kind: input, shape index: {}]   ;;  %s1419_s1 = inlined_call_operand.vmem [shape: f32[32,23], index: 1, kind: input, shape index: {}]   ;;  %s1420_s2 = inlined_call_operand.vmem [shape: f32[32,1], index: 2, kind: input, shape index: {}]   ;;  %s1421_s3 = inlined_call_operand.vmem [shape: f32[32,32], index: 3, kind: input, shape index: {}]   ;;  %s1422_s4 = inlined_call_operand.vmem [shape: f32[32,1], index: 4, kind: input, shape index: {}]   ;;  %s1423_s5 = inlined_call_operand.vmem [shape: f32[4,32], index: 5, kind: input, shape index: {}]   ;;  %s1424_s6 = inlined_call_operand.vmem [shape: f32[1,4], index: 6, kind: input, shape index: {}]   ;;  %s1425_s7 = inlined_call_operand.vmem [shape: f32[256,4], index: 7, kind: output, shape index: {}]  }
   0x1 LB: > { %s915_s25 = sadd.s32 4294967295, %s1181_s24   ;;  %p919_p0 = scmp.ge.s32.totalorder %s1181_s24, 1  ;;  %s1181_s24 = sphi %s1224_s24, %s17_s24  }
   0x2   : > { %p238_p1 = scmp.lt.s32.totalorder %s1181_s24, 3 }
   0x4   : > { %p239_p2 = pnand %p919_p0, %p238_p1 }
   0x5   : > { %s920_s26 = sshll.u32 (!%p239_p2), %s915_s25, 4  ;;  %vm336_vm0 = vcmask (!%p239_p2), 187392   ;;  %v282_v0 = vld [vmem:[%s1419_s1] sm:$0xff] (!%p239_p2)  ;;  %v1183_v1 = vmov (!%p239_p2), 0   ;;  %v288_v3 = vld [vmem:[%s1420_s2 + $0x10] sm:$0xff] (!%p239_p2)  ;;  %v287_v4 = vld [vmem:[%s1420_s2 + $0x8] sm:$0xff] (!%p239_p2) }
   0x6   : > { %242 = sbr.rel (%p239_p2) target bundleno = 950 (0x3b6), region = 48  ;;  %p271_p3 = scmp.lt.s32.totalorder (!%p239_p2), %s920_s26, 31  ;;  %1045 = vmatprep.mubr.msk.f32.mxu0 (!%p239_p2), %vm336_vm0, %v282_v0  ;;  %1157 = vset.pattern.permute.xlu0 (!%p239_p2), %v1183_v1  ;;  %v286_v2 = vld [vmem:[%s1420_s2] sm:$0xff] (!%p239_p2)  ;;  %v289_v5 = vld [vmem:[%s1420_s2 + $0x18] sm:$0xff] (!%p239_p2)  ;;  %vm1260_vm1 = vmpackc.low (!%p239_p2), %vm336_vm0, %vm336_vm0  ;;  %vm506_vm2 = vcmask (!%p239_p2), 261120   ;;  %vm842_vm3 = vcmask (!%p239_p2), 31744  }
   0x7   : > { %318 = vperm.xlu0 (!%p239_p2), %1157, %v286_v2   ;;  %1158 = vset.pattern.permute.xlu1 (!%p239_p2), %v1183_v1  ;;  %v294_v7 = vld [vmem:[%s1422_s4] sm:$0xff] (!%p239_p2)  ;;  %v295_v13 = vld [vmem:[%s1422_s4 + $0x8] sm:$0xff] (!%p239_p2)  ;;  %v296_v15 = vld [vmem:[%s1422_s4 + $0x10] sm:$0xff] (!%p239_p2) }
   0x8   : > { %328 = vperm.xlu1 (!%p239_p2), %1158, %v288_v3   ;;  %v297_v16 = vld [vmem:[%s1422_s4 + $0x18] sm:$0xff] (!%p239_p2)  ;;  %v283_v35 = vld [vmem:[%s1419_s1 + $0x8] sm:$0xff] (!%p239_p2)  ;;  %v284_v36 = vld [vmem:[%s1419_s1 + $0x10] sm:$0xff] (!%p239_p2) }
   0x9   : > { %v285_v37 = vld [vmem:[%s1419_s1 + $0x18] sm:$0xff] (!%p239_p2)  ;;  %v290_v38 = vld [vmem:[%s1421_s3] sm:$0xff] (!%p239_p2)  ;;  %v291_v57 = vld [vmem:[%s1421_s3 + $0x8] sm:$0xff] (!%p239_p2) }
   0xa   : > { %1059 = vmatprep.mubr.msk.f32.mxu1 (!%p239_p2), %vm506_vm2, %v290_v38  ;;  %v292_v58 = vld [vmem:[%s1421_s3 + $0x10] sm:$0xff] (!%p239_p2)  ;;  %v293_v59 = vld [vmem:[%s1421_s3 + $0x18] sm:$0xff] (!%p239_p2) }
   0xb   : > { %323 = vperm.xlu0 (!%p239_p2), %1157, %v287_v4  }
   0xc   : > { %333 = vperm.xlu1 (!%p239_p2), %1158, %v289_v5  }
   0xd   : > { %s1429_s26 = smov (!%p271_p3, %s920_s26), 31 }
   0xe   : > { %s921_s14 = sshll.u32 %s1429_s26, 3 }
   0xf   : > { %s1256_s17 = scalar_lea.vmem %s1418_s0, %s921_s14  ;;  %488 = vperm.xlu0 %1157, %v294_v7   ;;  %s1381_s28 = scalar_lea.vmem %s1425_s7, %s921_s14 }
  0x10   : > { %v300_v8 = vld [vmem:[%s1256_s17] sm:$0xff]  ;;  %v301_v9 = vld [vmem:[%s1256_s17 + $0x8] sm:$0xff]  ;;  %v302_v10 = vld [vmem:[%s1256_s17 + $0x10] sm:$0xff]  ;;  %493 = vperm.xlu1 %1158, %v295_v13  }
  0x11   : > { %v1091_v11 = vpack.c.bf16 %v301_v9, %v300_v8  ;;  %v303_v12 = vld [vmem:[%s1256_s17 + $0x18] sm:$0xff]  ;;  %v304_v17 = vld [vmem:[%s1256_s17 + $0x20] sm:$0xff]  ;;  %v305_v18 = vld [vmem:[%s1256_s17 + $0x28] sm:$0xff] }
  0x12   : > { %v1097_v14 = vpack.c.bf16 %v303_v12, %v302_v10  ;;  %v1103_v19 = vpack.c.bf16 %v305_v18, %v304_v17  ;;  %v306_v20 = vld [vmem:[%s1256_s17 + $0x30] sm:$0xff]  ;;  %v307_v21 = vld [vmem:[%s1256_s17 + $0x38] sm:$0xff]  ;;  %v308_v23 = vld [vmem:[%s1256_s17 + $0x40] sm:$0xff] }
  0x13   : > { %1093 = vmatprep.subr.msk.bf16.mxu0 %vm1260_vm1, %v1091_v11  ;;  %498 = vperm.xlu0 %1157, %v296_v15   ;;  %v1109_v22 = vpack.c.bf16 %v307_v21, %v306_v20  ;;  %v309_v24 = vld [vmem:[%s1256_s17 + $0x48] sm:$0xff]  ;;  %v310_v26 = vld [vmem:[%s1256_s17 + $0x50] sm:$0xff]  ;;  %v311_v27 = vld [vmem:[%s1256_s17 + $0x58] sm:$0xff] }
  0x14   : > { %1096 = vmatpush3.bf16.xpose.msk.msra.mxu0 %vm1260_vm1, %v1091_v11  ;;  %503 = vperm.xlu1 %1158, %v297_v16   ;;  %v1115_v25 = vpack.c.bf16 %v309_v24, %v308_v23  ;;  %v1121_v28 = vpack.c.bf16 %v311_v27, %v310_v26  ;;  %v312_v29 = vld [vmem:[%s1256_s17 + $0x60] sm:$0xff]  ;;  %v313_v30 = vld [vmem:[%s1256_s17 + $0x68] sm:$0xff]  ;;  %v314_v32 = vld [vmem:[%s1256_s17 + $0x70] sm:$0xff] }
  0x15   : > { %1099 = vmatprep.subr.msk.bf16.mxu0 %vm1260_vm1, %v1097_v14  ;;  %v1127_v31 = vpack.c.bf16 %v313_v30, %v312_v29  ;;  %v315_v33 = vld [vmem:[%s1256_s17 + $0x78] sm:$0xff]  ;;  %v298_v9 = vld [vmem:[%s1423_s5] sm:$0xf] }
  0x16   : > { %v1133_v34 = vpack.c.bf16 %v315_v33, %v314_v32  ;;  %v948_v29 = vld [vmem:[%s1424_s6] ss:$0 sm:$0xff] }
  0x1c   : > { %1102 = vmatpush3.bf16.xpose.msk.msra.mxu0 %vm1260_vm1, %v1097_v14 }
  0x1d   : > { %1105 = vmatprep.subr.msk.bf16.mxu0 %vm1260_vm1, %v1103_v19 }
  0x24   : > { %1108 = vmatpush3.bf16.xpose.msk.msra.mxu0 %vm1260_vm1, %v1103_v19 }
  0x25   : > { %1111 = vmatprep.subr.msk.bf16.mxu0 %vm1260_vm1, %v1109_v22 }
  0x2c   : > { %1114 = vmatpush3.bf16.xpose.msk.msra.mxu0 %vm1260_vm1, %v1109_v22 }
  0x2d   : > { %1117 = vmatprep.subr.msk.bf16.mxu0 %vm1260_vm1, %v1115_v25 }
  0x34   : > { %1120 = vmatpush3.bf16.xpose.msk.msra.mxu0 %vm1260_vm1, %v1115_v25 }
  0x35   : > { %1123 = vmatprep.subr.msk.bf16.mxu0 %vm1260_vm1, %v1121_v28 }
  0x3c   : > { %1126 = vmatpush3.bf16.xpose.msk.msra.mxu0 %vm1260_vm1, %v1121_v28 }
  0x3d   : > { %1129 = vmatprep.subr.msk.bf16.mxu0 %vm1260_vm1, %v1127_v31 }
  0x44   : > { %1132 = vmatpush3.bf16.xpose.msk.msra.mxu0 %vm1260_vm1, %v1127_v31 }
  0x45   : > { %1135 = vmatprep.subr.msk.bf16.mxu0 %vm1260_vm1, %v1133_v34 }
  0x4c   : > { %1138 = vmatpush3.bf16.xpose.msk.msra.mxu0 %vm1260_vm1, %v1133_v34 }
  0x53   : > { %1046 = vmatmul.mubr.msk.f32.vlgmr.msra.gmra.mrb[0].mxu0 %vm336_vm0, %v283_v35 }
  0x54   : > { %1048 = vmatprep.mubr.msk.f32.mxu0 %vm336_vm0, %v284_v36 }
  0x57   : > { %1049 = vmatmul.mubr.msk.f32.gmra.mrb[2].mxu0 %vm336_vm0, %v285_v37 }
  0x86   : > { %v319_v39 = vpop.permute.xlu0 %318 }
  0x87   : > { %v329_v40 = vpop.permute.xlu1 %328 }
  0x8a   : > { %v324_v41 = vpop.permute.xlu0 %323 }
  0x8b   : > { %v334_v46 = vpop.permute.xlu1 %333 }
  0x8e   : > { %v489_v61 = vpop.permute.xlu0 %488 }
  0x8f   : > { %v494_v0 = vpop.permute.xlu1 %493 }
  0x92   : > { %v499_v4 = vpop.permute.xlu0 %498 }
  0x93   : > { %v504_v6 = vpop.permute.xlu1 %503 }
 0x126   : > { %v1047_v42 = vpop.f32.mrb[0].mxu0 }
 0x127   : > { %v469_v43 = vadd.f32 %v1047_v42, %v324_v41  ;;  %v463_v44 = vpop.f32.mrb[1].mxu0 }
 0x128   : > { %v464_v45 = vadd.f32 %v463_v44, %v319_v39 }
 0x129   : > { %1159 = vtanh.f32 %v469_v43 }
 0x12a   : > { %1161 = vtanh.f32 %v464_v45  ;;  %v1050_v47 = vpop.f32.mrb[2].mxu0 }
 0x12b   : > { %v479_v48 = vadd.f32 %v1050_v47, %v334_v46  ;;  %v473_v49 = vpop.f32.mrb[3].mxu0 }
 0x12c   : > { %v474_v50 = vadd.f32 %v473_v49, %v329_v40 }
 0x12d   : > { %1163 = vtanh.f32 %v479_v48 }
 0x12e   : > { %1165 = vtanh.f32 %v474_v50 }
 0x133   : > { %v1160_v51 = vpop.eup %1159 }
 0x134   : > { %v1162_v52 = vpop.eup %1161 }
 0x135   : > { %v1139_v53 = vpack.c.bf16 %v1160_v51, %v1162_v52 }
 0x137   : > { %v1164_v54 = vpop.eup %1163  ;;  %1140 = vmatprep.subr.bf16.mxu1 %v1139_v53 }
 0x138   : > { %v1166_v55 = vpop.eup %1165  ;;  %1142 = vmatpush3.bf16.msra.mxu1 %v1139_v53 }
 0x139   : > { %v1143_v56 = vpack.c.bf16 %v1164_v54, %v1166_v55 }
 0x13b   : > { %1144 = vmatprep.subr.bf16.mxu1 %v1143_v56 }
 0x13c   : > { %1146 = vmatpush3.bf16.msra.mxu1 %v1143_v56 }
 0x13d   : > { %1065 = vmatprep.subr.msk.mxu1 %vm506_vm2, %v298_v9 }
 0x13f   : > { %1060 = vmatmul.mubr.msk.f32.vlgmr.msra.gmra.mrb[0].mxu1 %vm506_vm2, %v291_v57 }
 0x140   : > { %1062 = vmatprep.mubr.msk.f32.mxu1 %vm506_vm2, %v292_v58 }
 0x143   : > { %1063 = vmatmul.mubr.msk.f32.gmra.mrb[2].mxu1 %vm506_vm2, %v293_v59 }
 0x145   : > { %1066 = vmatpush3.xpose.msk.msra.mxu1 %vm506_vm2, %v298_v9 }
 0x212   : > { %v1061_v60 = vpop.f32.mrb[0].mxu1 }
 0x213   : > { %v585_v62 = vpop.f32.mrb[1].mxu1  ;;  %v591_v1 = vadd.f32 %v1061_v60, %v494_v0 }
 0x214   : > { %v586_v63 = vadd.f32 %v585_v62, %v489_v61 }
 0x216   : > { %1167 = vtanh.f32 %v586_v63  ;;  %v1064_v2 = vpop.f32.mrb[2].mxu1 }
 0x217   : > { %v595_v3 = vpop.f32.mrb[3].mxu1  ;;  %1169 = vtanh.f32 %v591_v1  ;;  %v601_v7 = vadd.f32 %v1064_v2, %v504_v6 }
 0x218   : > { %v596_v5 = vadd.f32 %v595_v3, %v499_v4 }
 0x21a   : > { %1171 = vtanh.f32 %v596_v5 }
 0x21b   : > { %1173 = vtanh.f32 %v601_v7 }
 0x220   : > { %v1168_v8 = vpop.eup %1167 }
 0x221   : > { %614 = vxpose.xlu0.b32.start [1/4] (short) %v1168_v8, 128  ;;  %v1170_v10 = vpop.eup %1169 }
 0x224   : > { %v1172_v11 = vpop.eup %1171 }
 0x225   : > { %615 = vxpose.xlu0.b32.cont [2/4] (short) %v1170_v10, 128  ;;  %v1174_v12 = vpop.eup %1173 }
 0x229   : > { %616 = vxpose.xlu0.b32.cont [3/4] (short) %v1172_v11, 128 }
 0x22d   : > { %617 = vxpose.xlu0.b32.end [4/4] (short) %v1174_v12, 128 }
 0x2a1   : > { %v630_v13 = vpop.trf.xlu0 }
 0x2a2   : > { %1067 = vmatprep.mubr.msk.f32.mxu1 %vm506_vm2, %v630_v13 }
 0x2a5   : > { %v631_v14 = vpop.trf.xlu0 }
 0x2a6   : > { %1068 = vmatmul.mubr.msk.f32.vlgmr.msra.gmra.mrb[4].mxu1 %vm506_vm2, %v631_v14 }
 0x2a9   : > { %v632_v15 = vpop.trf.xlu0 }
 0x2aa   : > { %1070 = vmatprep.mubr.msk.f32.mxu1 %vm506_vm2, %v632_v15 }
 0x2ad   : > { %v633_v16 = vpop.trf.xlu0 }
 0x2ae   : > { %1071 = vmatmul.mubr.msk.f32.gmra.mrb[6].mxu1 %vm506_vm2, %v633_v16 }
 0x2b1   : > { %v634_v17 = vpop.trf.xlu0 }
 0x2b2   : > { %1073 = vmatprep.mubr.msk.f32.mxu1 %vm506_vm2, %v634_v17 }
 0x2b5   : > { %v635_v18 = vpop.trf.xlu0 }
 0x2b6   : > { %1074 = vmatmul.mubr.msk.f32.gmra.mrb[8].mxu1 %vm506_vm2, %v635_v18 }
 0x2b9   : > { %v636_v19 = vpop.trf.xlu0 }
 0x2ba   : > { %1076 = vmatprep.mubr.msk.f32.mxu1 %vm506_vm2, %v636_v19 }
 0x2bd   : > { %v637_v20 = vpop.trf.xlu0 }
 0x2be   : > { %1077 = vmatmul.mubr.msk.f32.gmra.mrb[10].mxu1 %vm506_vm2, %v637_v20 }
 0x2c1   : > { %v638_v21 = vpop.trf.xlu0 }
 0x2c2   : > { %1079 = vmatprep.mubr.msk.f32.mxu1 %vm506_vm2, %v638_v21 }
 0x2c5   : > { %v639_v22 = vpop.trf.xlu0 }
 0x2c6   : > { %1080 = vmatmul.mubr.msk.f32.gmra.mrb[12].mxu1 %vm506_vm2, %v639_v22 }
 0x2c9   : > { %v640_v23 = vpop.trf.xlu0 }
 0x2ca   : > { %1082 = vmatprep.mubr.msk.f32.mxu1 %vm506_vm2, %v640_v23 }
 0x2cd   : > { %v641_v24 = vpop.trf.xlu0 }
 0x2ce   : > { %1083 = vmatmul.mubr.msk.f32.gmra.mrb[14].mxu1 %vm506_vm2, %v641_v24 }
 0x2d1   : > { %v642_v25 = vpop.trf.xlu0 }
 0x2d2   : > { %1085 = vmatprep.mubr.msk.f32.mxu1 %vm506_vm2, %v642_v25 }
 0x2d5   : > { %v643_v26 = vpop.trf.xlu0 }
 0x2d6   : > { %1086 = vmatmul.mubr.msk.f32.gmra.mrb[16].mxu1 %vm506_vm2, %v643_v26 }
 0x2d9   : > { %v644_v27 = vpop.trf.xlu0 }
 0x2da   : > { %1088 = vmatprep.mubr.msk.f32.mxu1 %vm506_vm2, %v644_v27 }
 0x2dd   : > { %v645_v28 = vpop.trf.xlu0 }
 0x2de   : > { %1089 = vmatmul.mubr.msk.f32.gmra.mrb[18].mxu1 %vm506_vm2, %v645_v28 }
 0x379   : > { %v1069_v30 = vpop.f32.mrb[4].mxu1 }
 0x37a   : > { %v769_v31 = vadd.f32 %v1069_v30, %v948_v29  ;;  %v763_v32 = vpop.f32.mrb[5].mxu1 }
 0x37b   : > { %v764_v33 = vadd.f32 %v948_v29, %v763_v32 }
 0x37c   : > { %844 = vst.msk [vmem:[%s1381_s28 + $0x8] sm:$0xff] %vm842_vm3, %v769_v31 }
 0x37d   : > { %843 = vst.msk [vmem:[%s1381_s28] sm:$0xff] %vm842_vm3, %v764_v33 }
 0x381   : > { %v1072_v34 = vpop.f32.mrb[6].mxu1 }
 0x382   : > { %v779_v35 = vadd.f32 %v1072_v34, %v948_v29  ;;  %v773_v36 = vpop.f32.mrb[7].mxu1 }
 0x383   : > { %v774_v37 = vadd.f32 %v948_v29, %v773_v36 }
 0x384   : > { %846 = vst.msk [vmem:[%s1381_s28 + $0x18] sm:$0xff] %vm842_vm3, %v779_v35 }
 0x385   : > { %845 = vst.msk [vmem:[%s1381_s28 + $0x10] sm:$0xff] %vm842_vm3, %v774_v37 }
 0x389   : > { %v1075_v38 = vpop.f32.mrb[8].mxu1 }
 0x38a   : > { %v789_v39 = vadd.f32 %v1075_v38, %v948_v29  ;;  %v783_v40 = vpop.f32.mrb[9].mxu1 }
 0x38b   : > { %v784_v41 = vadd.f32 %v948_v29, %v783_v40 }
 0x38c   : > { %848 = vst.msk [vmem:[%s1381_s28 + $0x28] sm:$0xff] %vm842_vm3, %v789_v39 }
 0x38d   : > { %847 = vst.msk [vmem:[%s1381_s28 + $0x20] sm:$0xff] %vm842_vm3, %v784_v41 }
 0x391   : > { %v1078_v42 = vpop.f32.mrb[10].mxu1 }
 0x392   : > { %v799_v43 = vadd.f32 %v1078_v42, %v948_v29  ;;  %v793_v44 = vpop.f32.mrb[11].mxu1 }
 0x393   : > { %v794_v45 = vadd.f32 %v948_v29, %v793_v44 }
 0x394   : > { %850 = vst.msk [vmem:[%s1381_s28 + $0x38] sm:$0xff] %vm842_vm3, %v799_v43 }
 0x395   : > { %849 = vst.msk [vmem:[%s1381_s28 + $0x30] sm:$0xff] %vm842_vm3, %v794_v45 }
 0x399   : > { %v1081_v46 = vpop.f32.mrb[12].mxu1 }
 0x39a   : > { %v809_v47 = vadd.f32 %v1081_v46, %v948_v29  ;;  %v803_v48 = vpop.f32.mrb[13].mxu1 }
 0x39b   : > { %v804_v49 = vadd.f32 %v948_v29, %v803_v48 }
 0x39c   : > { %852 = vst.msk [vmem:[%s1381_s28 + $0x48] sm:$0xff] %vm842_vm3, %v809_v47 }
 0x39d   : > { %851 = vst.msk [vmem:[%s1381_s28 + $0x40] sm:$0xff] %vm842_vm3, %v804_v49 }
 0x3a1   : > { %v1084_v50 = vpop.f32.mrb[14].mxu1 }
 0x3a2   : > { %v819_v51 = vadd.f32 %v1084_v50, %v948_v29  ;;  %v813_v52 = vpop.f32.mrb[15].mxu1 }
 0x3a3   : > { %v814_v53 = vadd.f32 %v948_v29, %v813_v52 }
 0x3a4   : > { %854 = vst.msk [vmem:[%s1381_s28 + $0x58] sm:$0xff] %vm842_vm3, %v819_v51 }
 0x3a5   : > { %853 = vst.msk [vmem:[%s1381_s28 + $0x50] sm:$0xff] %vm842_vm3, %v814_v53 }
 0x3a9   : > { %v1087_v54 = vpop.f32.mrb[16].mxu1 }
 0x3aa   : > { %v829_v55 = vadd.f32 %v1087_v54, %v948_v29  ;;  %v823_v56 = vpop.f32.mrb[17].mxu1 }
 0x3ab   : > { %v824_v57 = vadd.f32 %v948_v29, %v823_v56 }
 0x3ac   : > { %856 = vst.msk [vmem:[%s1381_s28 + $0x68] sm:$0xff] %vm842_vm3, %v829_v55 }
 0x3ad   : > { %855 = vst.msk [vmem:[%s1381_s28 + $0x60] sm:$0xff] %vm842_vm3, %v824_v57 }
 0x3b1   : > { %v1090_v58 = vpop.f32.mrb[18].mxu1 }
 0x3b2   : > { %v839_v59 = vadd.f32 %v1090_v58, %v948_v29  ;;  %v833_v60 = vpop.f32.mrb[19].mxu1 }
 0x3b3   : > { %v834_v61 = vadd.f32 %v948_v29, %v833_v60 }
 0x3b4   : > { %858 = vst.msk [vmem:[%s1381_s28 + $0x78] sm:$0xff] %vm842_vm3, %v839_v59 }
 0x3b5   : > { %857 = vst.msk [vmem:[%s1381_s28 + $0x70] sm:$0xff] %vm842_vm3, %v834_v61 }
 0x3b6 PF: > { %s17_s24 = sadd.s32 1, %s1181_s24  }
 0x3b7   : > { %p14_p4 = scmp.ge.s32.totalorder %s17_s24, 4  }
 0x3b9   :  { %16 = sbr.rel (!%p14_p4) target bundleno = 1 (0x1), region = 78 }

</bundles_post_ra>
